<compile_context>
chip_gen: v7x
topology: tpu7x:2x2x1
jax: 0.10.0
libtpu: 0.0.40
codegen_flags: <defaults>
</compile_context>

<pallas_src>
import functools

import jax
import jax.numpy as jnp
from jax.experimental import pallas as pl
from jax.experimental.pallas import tpu as pltpu


# ----------------------------- MHSA kernel -----------------------------------

def _mhsa_kernel(x_ref, wqkv_ref, bqkv_ref, wo_ref, bo_ref, o_ref, *, num_heads):
    Bb, L, E = x_ref.shape
    H = num_heads
    hd = E // H
    M = Bb * L

    x = x_ref[...].astype(jnp.bfloat16).reshape(M, E)

    # Fused, lane-dense QKV projection: one (M, E) @ (E, 3E) MXU matmul.
    qkv = jnp.dot(x, wqkv_ref[...], preferred_element_type=jnp.float32)
    qkv = (qkv + bqkv_ref[...]).astype(jnp.bfloat16)          # (M, 3E)

    def split_heads(base):
        # Per-head lane slice -> (Bb, L, hd); stack on a new MAJOR axis (cheap),
        # then flatten (head, batch) into one leading batch dim G = H*Bb.
        hs = [qkv[:, base + h * hd: base + (h + 1) * hd].reshape(Bb, L, hd)
              for h in range(H)]
        return jnp.stack(hs, axis=0).reshape(H * Bb, L, hd)    # (G, L, hd) bf16

    q = split_heads(0)          # 1/sqrt(hd) scale is pre-folded into Wq/bq
    k = split_heads(E)
    v = split_heads(2 * E)

    # Scaled dot-product attention; scores/softmax in f32, batched over (head, seq).
    s = jnp.einsum("gqd,gkd->gqk", q, k, preferred_element_type=jnp.float32)
    s = s - jnp.max(s, axis=-1, keepdims=True)
    p = jnp.exp(s)
    p = p * pl.reciprocal(jnp.sum(p, axis=-1, keepdims=True), approx=True)
    # TODO(synk): attention-weight dropout (p=0.25) is training-only; omitted (eval).

    o = jnp.einsum("gqk,gkd->gqd", p.astype(jnp.bfloat16), v,
                   preferred_element_type=jnp.float32)         # (G, L, hd)
    o = o.reshape(H, M, hd).astype(jnp.bfloat16)               # pure reshape (head-major)

    # Output projection: concat(heads) @ Wo == sum_h  o_h @ Wo_h  (no lane concat).
    proj = jnp.einsum("hmd,hde->hme", o, wo_ref[...],
                      preferred_element_type=jnp.float32)      # (H, M, E)
    attn = jnp.sum(proj, axis=0) + bo_ref[...]                 # (M, E)
    o_ref[...] = attn.reshape(Bb, L, E).astype(o_ref.dtype)


def _rep(shape):
    """Replicated (grid-invariant) full-array block."""
    zeros = (0,) * len(shape)
    return pl.BlockSpec(shape, lambda b: zeros)


def _pick_batch_block(B, target=8):
    """Largest divisor of B that is <= target, preferring >= 2 grid steps."""
    best = 1
    for bb in range(1, min(B, target) + 1):
        if B % bb == 0 and (B // bb >= 2 or B == 1):
            best = bb
    return best


def multi_head_self_attention(x, prep, *, num_heads, out_dtype=None):
    B, L, E = x.shape
    H = num_heads
    hd = E // H
    out_dtype = out_dtype or x.dtype
    Bb = _pick_batch_block(B)

    return pl.pallas_call(
        functools.partial(_mhsa_kernel, num_heads=num_heads),
        out_shape=jax.ShapeDtypeStruct((B, L, E), out_dtype),
        grid=(B // Bb,),
        in_specs=[
            pl.BlockSpec((Bb, L, E), lambda b: (b, 0, 0)),  # Bb sequences / step
            _rep((E, 3 * E)), _rep((1, 3 * E)),             # fused Wqkv (bf16), bias
            _rep((H, hd, E)), _rep((1, E)),                 # Wo per head (bf16), bo
        ],
        out_specs=pl.BlockSpec((Bb, L, E), lambda b: (b, 0, 0)),
        compiler_params=pltpu.CompilerParams(
            dimension_semantics=("parallel",),
            vmem_limit_bytes=48 * 1024 * 1024),
    )(x, prep["wqkv"], prep["bqkv"], prep["wo_h"], prep["bo"])


# ------------------------- K-tiled linear (MLP) kernel ------------------------

def _linear_kernel(x_ref, w_ref, b_ref, o_ref, acc_ref, *, activation):
    k = pl.program_id(1)

    @pl.when(k == 0)
    def _():
        acc_ref[...] = jnp.zeros_like(acc_ref)

    # bf16 activations x bf16 weights, f32 accumulation (no per-step casts).
    acc_ref[...] += jnp.dot(x_ref[...], w_ref[...],
                            preferred_element_type=jnp.float32)

    @pl.when(k == pl.num_programs(1) - 1)
    def _():
        y = acc_ref[...] + b_ref[...]
        if activation == "tanh":
            y = jnp.tanh(y)
        o_ref[...] = y.astype(o_ref.dtype)


def _pick_tile(dim, target):
    t = min(dim, target)
    while dim % t:
        t -= 1
    return t


def linear_layer(x, w, b2d, *, activation=None, out_dtype=None,
                 tile_n=512, tile_k=7680):
    """y = act(x @ w + b).  Large tiles: weight-DMA dominated layer runs near the
    HBM roofline (tk=7680 x tn=512 bf16 = 7.5 MiB per buffer, 15 MiB double-
    buffered -> fits the 48 MiB VMEM budget even on v7x)."""
    M, K = x.shape
    Kw, N = w.shape
    assert Kw == K and b2d.shape == (1, N)
    out_dtype = out_dtype or x.dtype
    tn = _pick_tile(N, tile_n)
    tk = _pick_tile(K, tile_k)

    return pl.pallas_call(
        functools.partial(_linear_kernel, activation=activation),
        out_shape=jax.ShapeDtypeStruct((M, N), out_dtype),
        grid=(N // tn, K // tk),                             # reduction axis last
        in_specs=[
            pl.BlockSpec((M, tk), lambda n, k: (0, k)),      # bf16 activations
            pl.BlockSpec((tk, tn), lambda n, k: (k, n)),     # bf16 weight tile
            pl.BlockSpec((1, tn), lambda n, k: (0, n)),      # f32 bias tile
        ],
        out_specs=pl.BlockSpec((M, tn), lambda n, k: (0, n)),
        scratch_shapes=[pltpu.VMEM((M, tn), jnp.float32)],   # f32 accumulator
        compiler_params=pltpu.CompilerParams(
            dimension_semantics=("parallel", "arbitrary"),
            vmem_limit_bytes=48 * 1024 * 1024),
    )(x, w, b2d)


# ----------------------- one-time parameter preparation ----------------------

def prepare_params(params, *, num_heads):
    """Hoisted out of the forward path: layout transforms + bf16 casts done ONCE."""
    E = params["wq"].shape[0]
    H = num_heads
    hd = E // H
    scale = float(hd) ** -0.5
    # Fold the 1/sqrt(hd) query scale into Wq/bq (mathematically identical).
    wqkv = jnp.concatenate([params["wq"] * scale, params["wk"], params["wv"]],
                           axis=1)                                  # (E, 3E)
    bqkv = jnp.concatenate([params["bq"] * scale, params["bk"], params["bv"]],
                           axis=0)                                  # (3E,)
    return {
        "wqkv": wqkv.astype(jnp.bfloat16),
        "bqkv": bqkv.reshape(1, 3 * E).astype(jnp.float32),
        "wo_h": params["wo"].reshape(H, hd, E).astype(jnp.bfloat16),
        "bo":   params["bo"].reshape(1, E).astype(jnp.float32),
        # TODO(synk): optional int8 (v5e/v6e) / fp8 (v7x) weight quantization of
        # w1/w2 would halve the HBM-bound MLP weight stream again.
        "w1":   params["w1"].astype(jnp.bfloat16),
        "b1":   params["b1"].reshape(1, -1).astype(jnp.float32),
        "w2":   params["w2"].astype(jnp.bfloat16),
        "b2":   params["b2"].reshape(1, -1).astype(jnp.float32),
    }


# ------------------------------ full forward ---------------------------------

def self_attention_module(x, prep, *, num_heads):
    B, L, E = x.shape
    # MHSA emits bf16 directly (halves HBM writeback; MLP matmuls consume bf16).
    attn = multi_head_self_attention(x, prep, num_heads=num_heads,
                                     out_dtype=jnp.bfloat16)
    flat = attn.reshape(B, L * E)                 # torch .reshape(-1, L*E)
    h = linear_layer(flat, prep["w1"], prep["b1"], activation="tanh",
                     out_dtype=jnp.bfloat16)
    out = linear_layer(h, prep["w2"], prep["b2"], activation=None,
                       out_dtype=jnp.float32)
    return out


# ------------------------------ pure-JAX reference ----------------------------

def self_attention_module_ref(x, params, *, num_heads):
    B, L, E = x.shape
    hd = E // num_heads
    scale = hd ** -0.5

    q = x @ params["wq"] + params["bq"]
    k = x @ params["wk"] + params["bk"]
    v = x @ params["wv"] + params["bv"]

    def split(t):
        return t.reshape(B, L, num_heads, hd).transpose(0, 2, 1, 3)

    q, k, v = split(q), split(k), split(v)
    s = jnp.einsum("bhqd,bhkd->bhqk", q, k) * scale
    p = jax.nn.softmax(s, axis=-1)
    o = jnp.einsum("bhqk,bhkd->bhqd", p, v)
    o = o.transpose(0, 2, 1, 3).reshape(B, L, E)
    attn = o @ params["wo"] + params["bo"]
    flat = attn.reshape(B, L * E)
    h = jnp.tanh(flat @ params["w1"] + params["b1"])
    return h @ params["w2"] + params["b2"]


def make_params(key, embed, seq, prefix):
    d0 = embed * seq
    d1 = d0 // 2
    d2 = embed * prefix
    ks = jax.random.split(key, 10)
    s = 0.05
    return {
        "wq": s * jax.random.normal(ks[0], (embed, embed), jnp.float32),
        "bq": 0.02 * jax.random.normal(ks[1], (embed,), jnp.float32),
        "wk": s * jax.random.normal(ks[2], (embed, embed), jnp.float32),
        "bk": 0.02 * jax.random.normal(ks[3], (embed,), jnp.float32),
        "wv": s * jax.random.normal(ks[4], (embed, embed), jnp.float32),
        "bv": 0.02 * jax.random.normal(ks[5], (embed,), jnp.float32),
        "wo": s * jax.random.normal(ks[6], (embed, embed), jnp.float32),
        "bo": 0.02 * jax.random.normal(ks[7], (embed,), jnp.float32),
        "w1": s * jax.random.normal(ks[8], (d0, d1), jnp.float32),
        "b1": 0.02 * jnp.ones((d1,), jnp.float32),
        "w2": s * jax.random.normal(ks[9], (d1, d2), jnp.float32),
        "b2": 0.02 * jnp.ones((d2,), jnp.float32),
    }


if __name__ == "__main__":
    # Small-shape analogue of SelfAttentionModule(num_heads=12, embed=768,
    # max_caption_length=40, prefix_length=10):
    B = 2
    NUM_HEADS = 4
    EMBED = 32       # clip_image_embedding_length == gpt2_embedding_length
    SEQ = 8          # max_caption_length
    PREFIX = 2       # prefix_length

    key = jax.random.PRNGKey(0)
    kx, kp = jax.random.split(key)
    x = jax.random.normal(kx, (B, SEQ, EMBED), jnp.float32)
    params = make_params(kp, EMBED, SEQ, PREFIX)

    prep = prepare_params(params, num_heads=NUM_HEADS)        # one-time weight prep
    fwd = jax.jit(functools.partial(self_attention_module, num_heads=NUM_HEADS))

    out = fwd(x, prep)
    out = jax.block_until_ready(out)

    ref = self_attention_module_ref(x, params, num_heads=NUM_HEADS)
    assert out.shape == (B, EMBED * PREFIX)
    # bf16 matmul inputs / bf16 intermediate activations (f32 accumulation) and
    # approx reciprocal -> compare against the f32 reference with bf16 tolerance.
    assert jnp.allclose(out, ref, rtol=2e-2, atol=2e-2), "mismatch vs reference"

    print("KERNEL_OK")
</pallas_src>

<mosaic_0001>
module attributes {stable_mosaic.version = 11 : i64} {
  func.func @_linear_kernel(%arg0: i32, %arg1: i32, %arg2: memref<2x256xbf16, #tpu.memory_space<vmem>>, %arg3: memref<256x128xbf16, #tpu.memory_space<vmem>>, %arg4: memref<1x128xf32, #tpu.memory_space<vmem>>, %arg5: memref<2x128xbf16, #tpu.memory_space<vmem>>, %arg6: memref<2x128xf32, #tpu.memory_space<vmem>>) attributes {dimension_semantics = [#tpu.dimension_semantics<parallel>, #tpu.dimension_semantics<arbitrary>], iteration_bounds = array<i64: 1, 1>, scalar_prefetch = 0 : i64, scratch_operands = 1 : i64, tpu.core_type = #tpu.core_type<tc>, window_params = [{transform_indices = @transform_0, window_bounds = array<i64: 2, 256>}, {transform_indices = @transform_1, window_bounds = array<i64: 256, 128>}, {transform_indices = @transform_2, window_bounds = array<i64: 1, 128>}, {transform_indices = @transform_3, window_bounds = array<i64: 2, 128>}]} {
    %c0_i32 = arith.constant 0 : i32
    %0 = arith.cmpi eq, %arg1, %c0_i32 : i32
    %1 = arith.extui %0 : i1 to i32
    %c0_i32_0 = arith.constant 0 : i32
    %2 = arith.cmpi ne, %1, %c0_i32_0 : i32
    scf.if %2 {
      %cst_10 = arith.constant 0.000000e+00 : f32
      %12 = vector.broadcast %cst_10 : f32 to vector<2x128xf32>
      %c0_11 = arith.constant 0 : index
      %c0_12 = arith.constant 0 : index
      %13 = vector.load %arg6[%c0_11, %c0_12] : memref<2x128xf32, #tpu.memory_space<vmem>>, vector<2x128xf32>
      tpu.vector_store %arg6[%c0_11, %c0_12], %12 {strides = array<i32>} : memref<2x128xf32, #tpu.memory_space<vmem>>, vector<2x128xf32>,
    } else {
    }
    %c0 = arith.constant 0 : index
    %c0_1 = arith.constant 0 : index
    %3 = vector.load %arg6[%c0, %c0_1] : memref<2x128xf32, #tpu.memory_space<vmem>>, vector<2x128xf32>
    %c0_2 = arith.constant 0 : index
    %c0_3 = arith.constant 0 : index
    %4 = vector.load %arg2[%c0_2, %c0_3] : memref<2x256xbf16, #tpu.memory_space<vmem>>, vector<2x256xbf16>
    %c0_4 = arith.constant 0 : index
    %c0_5 = arith.constant 0 : index
    %5 = vector.load %arg3[%c0_4, %c0_5] : memref<256x128xbf16, #tpu.memory_space<vmem>>, vector<256x128xbf16>
    %cst = arith.constant dense<0.000000e+00> : vector<2x128xf32>
    %6 = tpu.matmul %4, %5, %cst {dimension_numbers = #tpu.dot_dimension_numbers<[1], [0], [0], [1], [0, 0, 1, 1], [], []>} : vector<2x256xbf16>, vector<256x128xbf16>, vector<2x128xf32> -> vector<2x128xf32>
    %7 = arith.addf %3, %6 : vector<2x128xf32>
    %c0_6 = arith.constant 0 : index
    %c0_7 = arith.constant 0 : index
    %8 = vector.load %arg6[%c0_6, %c0_7] : memref<2x128xf32, #tpu.memory_space<vmem>>, vector<2x128xf32>
    tpu.vector_store %arg6[%c0_6, %c0_7], %7 {strides = array<i32>} : memref<2x128xf32, #tpu.memory_space<vmem>>, vector<2x128xf32>,
    %c0_i32_8 = arith.constant 0 : i32
    %9 = arith.cmpi eq, %arg1, %c0_i32_8 : i32
    %10 = arith.extui %9 : i1 to i32
    %c0_i32_9 = arith.constant 0 : i32
    %11 = arith.cmpi ne, %10, %c0_i32_9 : i32
    scf.if %11 {
      %c0_10 = arith.constant 0 : index
      %c0_11 = arith.constant 0 : index
      %12 = vector.load %arg6[%c0_10, %c0_11] : memref<2x128xf32, #tpu.memory_space<vmem>>, vector<2x128xf32>
      %c0_12 = arith.constant 0 : index
      %c0_13 = arith.constant 0 : index
      %13 = vector.load %arg4[%c0_12, %c0_13] : memref<1x128xf32, #tpu.memory_space<vmem>>, vector<1x128xf32>
      %14 = vector.broadcast %13 : vector<1x128xf32> to vector<2x128xf32>
      %15 = arith.addf %12, %14 : vector<2x128xf32>
      %16 = math.tanh %15 : vector<2x128xf32>
      %17 = arith.truncf %16 : vector<2x128xf32> to vector<2x128xbf16>
      %c0_14 = arith.constant 0 : index
      %c0_15 = arith.constant 0 : index
      %18 = vector.load %arg5[%c0_14, %c0_15] : memref<2x128xbf16, #tpu.memory_space<vmem>>, vector<2x128xbf16>
      tpu.vector_store %arg5[%c0_14, %c0_15], %17 {strides = array<i32>} : memref<2x128xbf16, #tpu.memory_space<vmem>>, vector<2x128xbf16>,
    } else {
    }
    return
  }
  func.func @transform_0(%arg0: i32, %arg1: i32) -> (i32, i32) {
    %c0_i32 = arith.constant 0 : i32
    %c0_i32_0 = arith.constant 0 : i32
    return %c0_i32, %arg1 : i32, i32
  }
  func.func @transform_1(%arg0: i32, %arg1: i32) -> (i32, i32) {
    %c0_i32 = arith.constant 0 : i32
    return %arg1, %arg0 : i32, i32
  }
  func.func @transform_2(%arg0: i32, %arg1: i32) -> (i32, i32) {
    %c0_i32 = arith.constant 0 : i32
    %c0_i32_0 = arith.constant 0 : i32
    return %c0_i32, %arg0 : i32, i32
  }
  func.func @transform_3(%arg0: i32, %arg1: i32) -> (i32, i32) {
    %c0_i32 = arith.constant 0 : i32
    %c0_i32_0 = arith.constant 0 : i32
    return %c0_i32, %arg0 : i32, i32
  }
}

module attributes {stable_mosaic.version = 11 : i64} {
  func.func @_mhsa_kernel(%arg0: i32, %arg1: memref<1x8x32xf32, #tpu.memory_space<vmem>>, %arg2: memref<32x96xbf16, #tpu.memory_space<vmem>>, %arg3: memref<1x96xf32, #tpu.memory_space<vmem>>, %arg4: memref<4x8x32xbf16, #tpu.memory_space<vmem>>, %arg5: memref<1x32xf32, #tpu.memory_space<vmem>>, %arg6: memref<1x8x32xbf16, #tpu.memory_space<vmem>>) attributes {dimension_semantics = [#tpu.dimension_semantics<parallel>], iteration_bounds = array<i64: 2>, scalar_prefetch = 0 : i64, scratch_operands = 0 : i64, tpu.core_type = #tpu.core_type<tc>, window_params = [{transform_indices = @transform_0, window_bounds = array<i64: 1, 8, 32>}, {pipeline_mode = #tpu.pipeline_mode<synchronous>, transform_indices = @transform_1, window_bounds = array<i64: 32, 96>}, {pipeline_mode = #tpu.pipeline_mode<synchronous>, transform_indices = @transform_2, window_bounds = array<i64: 1, 96>}, {pipeline_mode = #tpu.pipeline_mode<synchronous>, transform_indices = @transform_3, window_bounds = array<i64: 4, 8, 32>}, {pipeline_mode = #tpu.pipeline_mode<synchronous>, transform_indices = @transform_4, window_bounds = array<i64: 1, 32>}, {transform_indices = @transform_5, window_bounds = array<i64: 1, 8, 32>}]} {
    %c0 = arith.constant 0 : index
    %c0_0 = arith.constant 0 : index
    %c0_1 = arith.constant 0 : index
    %0 = vector.load %arg1[%c0, %c0_0, %c0_1] : memref<1x8x32xf32, #tpu.memory_space<vmem>>, vector<1x8x32xf32>
    %1 = arith.truncf %0 : vector<1x8x32xf32> to vector<1x8x32xbf16>
    %2 = vector.shape_cast %1 : vector<1x8x32xbf16> to vector<8x32xbf16>
    %c0_2 = arith.constant 0 : index
    %c0_3 = arith.constant 0 : index
    %3 = vector.load %arg2[%c0_2, %c0_3] : memref<32x96xbf16, #tpu.memory_space<vmem>>, vector<32x96xbf16>
    %cst = arith.constant dense<0.000000e+00> : vector<8x96xf32>
    %4 = tpu.matmul %2, %3, %cst {dimension_numbers = #tpu.dot_dimension_numbers<[1], [0], [0], [1], [0, 0, 1, 1], [], []>} : vector<8x32xbf16>, vector<32x96xbf16>, vector<8x96xf32> -> vector<8x96xf32>
    %c0_4 = arith.constant 0 : index
    %c0_5 = arith.constant 0 : index
    %5 = vector.load %arg3[%c0_4, %c0_5] : memref<1x96xf32, #tpu.memory_space<vmem>>, vector<1x96xf32>
    %6 = vector.broadcast %5 : vector<1x96xf32> to vector<8x96xf32>
    %7 = arith.addf %4, %6 : vector<8x96xf32>
    %8 = arith.truncf %7 : vector<8x96xf32> to vector<8x96xbf16>
    %9 = vector.extract_strided_slice %8 {offsets = [0, 0], sizes = [8, 8], strides = [1, 1]} : vector<8x96xbf16> to vector<8x8xbf16>
    %10 = vector.shape_cast %9 : vector<8x8xbf16> to vector<1x8x8xbf16>
    %11 = vector.extract_strided_slice %8 {offsets = [0, 8], sizes = [8, 8], strides = [1, 1]} : vector<8x96xbf16> to vector<8x8xbf16>
    %12 = vector.shape_cast %11 : vector<8x8xbf16> to vector<1x8x8xbf16>
    %13 = vector.extract_strided_slice %8 {offsets = [0, 16], sizes = [8, 8], strides = [1, 1]} : vector<8x96xbf16> to vector<8x8xbf16>
    %14 = vector.shape_cast %13 : vector<8x8xbf16> to vector<1x8x8xbf16>
    %15 = vector.extract_strided_slice %8 {offsets = [0, 24], sizes = [8, 8], strides = [1, 1]} : vector<8x96xbf16> to vector<8x8xbf16>
    %16 = vector.shape_cast %15 : vector<8x8xbf16> to vector<1x8x8xbf16>
    %17 = vector.shape_cast %10 : vector<1x8x8xbf16> to vector<1x1x8x8xbf16>
    %18 = vector.shape_cast %12 : vector<1x8x8xbf16> to vector<1x1x8x8xbf16>
    %19 = vector.shape_cast %14 : vector<1x8x8xbf16> to vector<1x1x8x8xbf16>
    %20 = vector.shape_cast %16 : vector<1x8x8xbf16> to vector<1x1x8x8xbf16>
    %21 = tpu.concatenate %17, %18, %19, %20 in 0 : vector<1x1x8x8xbf16>, vector<1x1x8x8xbf16>, vector<1x1x8x8xbf16>, vector<1x1x8x8xbf16> -> vector<4x1x8x8xbf16>
    %22 = vector.shape_cast %21 : vector<4x1x8x8xbf16> to vector<4x8x8xbf16>
    %23 = vector.extract_strided_slice %8 {offsets = [0, 32], sizes = [8, 8], strides = [1, 1]} : vector<8x96xbf16> to vector<8x8xbf16>
    %24 = vector.shape_cast %23 : vector<8x8xbf16> to vector<1x8x8xbf16>
    %25 = vector.extract_strided_slice %8 {offsets = [0, 40], sizes = [8, 8], strides = [1, 1]} : vector<8x96xbf16> to vector<8x8xbf16>
    %26 = vector.shape_cast %25 : vector<8x8xbf16> to vector<1x8x8xbf16>
    %27 = vector.extract_strided_slice %8 {offsets = [0, 48], sizes = [8, 8], strides = [1, 1]} : vector<8x96xbf16> to vector<8x8xbf16>
    %28 = vector.shape_cast %27 : vector<8x8xbf16> to vector<1x8x8xbf16>
    %29 = vector.extract_strided_slice %8 {offsets = [0, 56], sizes = [8, 8], strides = [1, 1]} : vector<8x96xbf16> to vector<8x8xbf16>
    %30 = vector.shape_cast %29 : vector<8x8xbf16> to vector<1x8x8xbf16>
    %31 = vector.shape_cast %24 : vector<1x8x8xbf16> to vector<1x1x8x8xbf16>
    %32 = vector.shape_cast %26 : vector<1x8x8xbf16> to vector<1x1x8x8xbf16>
    %33 = vector.shape_cast %28 : vector<1x8x8xbf16> to vector<1x1x8x8xbf16>
    %34 = vector.shape_cast %30 : vector<1x8x8xbf16> to vector<1x1x8x8xbf16>
    %35 = tpu.concatenate %31, %32, %33, %34 in 0 : vector<1x1x8x8xbf16>, vector<1x1x8x8xbf16>, vector<1x1x8x8xbf16>, vector<1x1x8x8xbf16> -> vector<4x1x8x8xbf16>
    %36 = vector.shape_cast %35 : vector<4x1x8x8xbf16> to vector<4x8x8xbf16>
    %37 = vector.extract_strided_slice %8 {offsets = [0, 64], sizes = [8, 8], strides = [1, 1]} : vector<8x96xbf16> to vector<8x8xbf16>
    %38 = vector.shape_cast %37 : vector<8x8xbf16> to vector<1x8x8xbf16>
    %39 = vector.extract_strided_slice %8 {offsets = [0, 72], sizes = [8, 8], strides = [1, 1]} : vector<8x96xbf16> to vector<8x8xbf16>
    %40 = vector.shape_cast %39 : vector<8x8xbf16> to vector<1x8x8xbf16>
    %41 = vector.extract_strided_slice %8 {offsets = [0, 80], sizes = [8, 8], strides = [1, 1]} : vector<8x96xbf16> to vector<8x8xbf16>
    %42 = vector.shape_cast %41 : vector<8x8xbf16> to vector<1x8x8xbf16>
    %43 = vector.extract_strided_slice %8 {offsets = [0, 88], sizes = [8, 8], strides = [1, 1]} : vector<8x96xbf16> to vector<8x8xbf16>
    %44 = vector.shape_cast %43 : vector<8x8xbf16> to vector<1x8x8xbf16>
    %45 = vector.shape_cast %38 : vector<1x8x8xbf16> to vector<1x1x8x8xbf16>
    %46 = vector.shape_cast %40 : vector<1x8x8xbf16> to vector<1x1x8x8xbf16>
    %47 = vector.shape_cast %42 : vector<1x8x8xbf16> to vector<1x1x8x8xbf16>
    %48 = vector.shape_cast %44 : vector<1x8x8xbf16> to vector<1x1x8x8xbf16>
    %49 = tpu.concatenate %45, %46, %47, %48 in 0 : vector<1x1x8x8xbf16>, vector<1x1x8x8xbf16>, vector<1x1x8x8xbf16>, vector<1x1x8x8xbf16> -> vector<4x1x8x8xbf16>
    %50 = vector.shape_cast %49 : vector<4x1x8x8xbf16> to vector<4x8x8xbf16>
    "tpu.trace_start"() <{level = 10 : i32, message = "gqd,gkd->gqk"}> : () -> ()
    %cst_6 = arith.constant dense<0.000000e+00> : vector<4x8x8xf32>
    %51 = tpu.matmul %22, %36, %cst_6 {dimension_numbers = #tpu.dot_dimension_numbers<[2], [2], [1], [1], [0, 0, 0, 1, 1, 1], [0], [0]>} : vector<4x8x8xbf16>, vector<4x8x8xbf16>, vector<4x8x8xf32> -> vector<4x8x8xf32>
    "tpu.trace_stop"() : () -> ()
    %cst_7 = arith.constant dense<0xFF800000> : vector<4x8xf32>
    %52 = vector.multi_reduction <maximumf>, %51, %cst_7 [2] : vector<4x8x8xf32> to vector<4x8xf32>
    %53 = vector.shape_cast %52 : vector<4x8xf32> to vector<4x8x1xf32>
    %54 = vector.broadcast %53 : vector<4x8x1xf32> to vector<4x8x8xf32>
    %55 = arith.subf %51, %54 : vector<4x8x8xf32>
    %56 = math.exp %55 : vector<4x8x8xf32>
    %cst_8 = arith.constant dense<0.000000e+00> : vector<4x8xf32>
    %57 = vector.multi_reduction <add>, %56, %cst_8 [2] : vector<4x8x8xf32> to vector<4x8xf32>
    %58 = vector.shape_cast %57 : vector<4x8xf32> to vector<4x8x1xf32>
    %59 = tpu.reciprocal %58 {approx = true} : vector<4x8x1xf32> -> vector<4x8x1xf32>
    %60 = vector.broadcast %59 : vector<4x8x1xf32> to vector<4x8x8xf32>
    %61 = arith.mulf %56, %60 : vector<4x8x8xf32>
    %62 = arith.truncf %61 : vector<4x8x8xf32> to vector<4x8x8xbf16>
    "tpu.trace_start"() <{level = 10 : i32, message = "gqk,gkd->gqd"}> : () -> ()
    %cst_9 = arith.constant dense<0.000000e+00> : vector<4x8x8xf32>
    %63 = tpu.matmul %62, %50, %cst_9 {dimension_numbers = #tpu.dot_dimension_numbers<[2], [1], [1], [2], [0, 0, 0, 1, 1, 2], [0], [0]>} : vector<4x8x8xbf16>, vector<4x8x8xbf16>, vector<4x8x8xf32> -> vector<4x8x8xf32>
    "tpu.trace_stop"() : () -> ()
    %64 = arith.truncf %63 : vector<4x8x8xf32> to vector<4x8x8xbf16>
    %c0_10 = arith.constant 0 : index
    %c0_11 = arith.constant 0 : index
    %c0_12 = arith.constant 0 : index
    %65 = vector.load %arg4[%c0_10, %c0_11, %c0_12] : memref<4x8x32xbf16, #tpu.memory_space<vmem>>, vector<4x8x32xbf16>
    "tpu.trace_start"() <{level = 10 : i32, message = "hmd,hde->hme"}> : () -> ()
    %cst_13 = arith.constant dense<0.000000e+00> : vector<4x8x32xf32>
    %66 = tpu.matmul %64, %65, %cst_13 {dimension_numbers = #tpu.dot_dimension_numbers<[2], [1], [1], [2], [0, 0, 0, 1, 1, 2], [0], [0]>} : vector<4x8x8xbf16>, vector<4x8x32xbf16>, vector<4x8x32xf32> -> vector<4x8x32xf32>
    "tpu.trace_stop"() : () -> ()
    %cst_14 = arith.constant dense<0.000000e+00> : vector<8x32xf32>
    %67 = vector.multi_reduction <add>, %66, %cst_14 [0] : vector<4x8x32xf32> to vector<8x32xf32>
    %c0_15 = arith.constant 0 : index
    %c0_16 = arith.constant 0 : index
    %68 = vector.load %arg5[%c0_15, %c0_16] : memref<1x32xf32, #tpu.memory_space<vmem>>, vector<1x32xf32>
    %69 = vector.broadcast %68 : vector<1x32xf32> to vector<8x32xf32>
    %70 = arith.addf %67, %69 : vector<8x32xf32>
    %71 = vector.shape_cast %70 : vector<8x32xf32> to vector<1x8x32xf32>
    %72 = arith.truncf %71 : vector<1x8x32xf32> to vector<1x8x32xbf16>
    %c0_17 = arith.constant 0 : index
    %c0_18 = arith.constant 0 : index
    %c0_19 = arith.constant 0 : index
    %73 = vector.load %arg6[%c0_17, %c0_18, %c0_19] : memref<1x8x32xbf16, #tpu.memory_space<vmem>>, vector<1x8x32xbf16>
    tpu.vector_store %arg6[%c0_17, %c0_18, %c0_19], %72 {strides = array<i32>} : memref<1x8x32xbf16, #tpu.memory_space<vmem>>, vector<1x8x32xbf16>,
    return
  }
  func.func @transform_0(%arg0: i32) -> (i32, i32, i32) {
    %c0_i32 = arith.constant 0 : i32
    %c0_i32_0 = arith.constant 0 : i32
    %c0_i32_1 = arith.constant 0 : i32
    return %arg0, %c0_i32, %c0_i32_0 : i32, i32, i32
  }
  func.func @transform_1(%arg0: i32) -> (i32, i32) {
    %c0_i32 = arith.constant 0 : i32
    %c0_i32_0 = arith.constant 0 : i32
    %c0_i32_1 = arith.constant 0 : i32
    return %c0_i32, %c0_i32_0 : i32, i32
  }
  func.func @transform_2(%arg0: i32) -> (i32, i32) {
    %c0_i32 = arith.constant 0 : i32
    %c0_i32_0 = arith.constant 0 : i32
    %c0_i32_1 = arith.constant 0 : i32
    return %c0_i32, %c0_i32_0 : i32, i32
  }
  func.func @transform_3(%arg0: i32) -> (i32, i32, i32) {
    %c0_i32 = arith.constant 0 : i32
    %c0_i32_0 = arith.constant 0 : i32
    %c0_i32_1 = arith.constant 0 : i32
    %c0_i32_2 = arith.constant 0 : i32
    return %c0_i32, %c0_i32_0, %c0_i32_1 : i32, i32, i32
  }
  func.func @transform_4(%arg0: i32) -> (i32, i32) {
    %c0_i32 = arith.constant 0 : i32
    %c0_i32_0 = arith.constant 0 : i32
    %c0_i32_1 = arith.constant 0 : i32
    return %c0_i32, %c0_i32_0 : i32, i32
  }
  func.func @transform_5(%arg0: i32) -> (i32, i32, i32) {
    %c0_i32 = arith.constant 0 : i32
    %c0_i32_0 = arith.constant 0 : i32
    %c0_i32_1 = arith.constant 0 : i32
    return %arg0, %c0_i32, %c0_i32_0 : i32, i32, i32
  }
}

module attributes {stable_mosaic.version = 11 : i64} {
  func.func @_linear_kernel(%arg0: i32, %arg1: i32, %arg2: memref<2x128xbf16, #tpu.memory_space<vmem>>, %arg3: memref<128x64xbf16, #tpu.memory_space<vmem>>, %arg4: memref<1x64xf32, #tpu.memory_space<vmem>>, %arg5: memref<2x64xf32, #tpu.memory_space<vmem>>, %arg6: memref<2x64xf32, #tpu.memory_space<vmem>>) attributes {dimension_semantics = [#tpu.dimension_semantics<parallel>, #tpu.dimension_semantics<arbitrary>], iteration_bounds = array<i64: 1, 1>, scalar_prefetch = 0 : i64, scratch_operands = 1 : i64, tpu.core_type = #tpu.core_type<tc>, window_params = [{transform_indices = @transform_0, window_bounds = array<i64: 2, 128>}, {transform_indices = @transform_1, window_bounds = array<i64: 128, 64>}, {transform_indices = @transform_2, window_bounds = array<i64: 1, 64>}, {transform_indices = @transform_3, window_bounds = array<i64: 2, 64>}]} {
    %c0_i32 = arith.constant 0 : i32
    %0 = arith.cmpi eq, %arg1, %c0_i32 : i32
    %1 = arith.extui %0 : i1 to i32
    %c0_i32_0 = arith.constant 0 : i32
    %2 = arith.cmpi ne, %1, %c0_i32_0 : i32
    scf.if %2 {
      %cst_10 = arith.constant 0.000000e+00 : f32
      %12 = vector.broadcast %cst_10 : f32 to vector<2x64xf32>
      %c0_11 = arith.constant 0 : index
      %c0_12 = arith.constant 0 : index
      %13 = vector.load %arg6[%c0_11, %c0_12] : memref<2x64xf32, #tpu.memory_space<vmem>>, vector<2x64xf32>
      tpu.vector_store %arg6[%c0_11, %c0_12], %12 {strides = array<i32>} : memref<2x64xf32, #tpu.memory_space<vmem>>, vector<2x64xf32>,
    } else {
    }
    %c0 = arith.constant 0 : index
    %c0_1 = arith.constant 0 : index
    %3 = vector.load %arg6[%c0, %c0_1] : memref<2x64xf32, #tpu.memory_space<vmem>>, vector<2x64xf32>
    %c0_2 = arith.constant 0 : index
    %c0_3 = arith.constant 0 : index
    %4 = vector.load %arg2[%c0_2, %c0_3] : memref<2x128xbf16, #tpu.memory_space<vmem>>, vector<2x128xbf16>
    %c0_4 = arith.constant 0 : index
    %c0_5 = arith.constant 0 : index
    %5 = vector.load %arg3[%c0_4, %c0_5] : memref<128x64xbf16, #tpu.memory_space<vmem>>, vector<128x64xbf16>
    %cst = arith.constant dense<0.000000e+00> : vector<2x64xf32>
    %6 = tpu.matmul %4, %5, %cst {dimension_numbers = #tpu.dot_dimension_numbers<[1], [0], [0], [1], [0, 0, 1, 1], [], []>} : vector<2x128xbf16>, vector<128x64xbf16>, vector<2x64xf32> -> vector<2x64xf32>
    %7 = arith.addf %3, %6 : vector<2x64xf32>
    %c0_6 = arith.constant 0 : index
    %c0_7 = arith.constant 0 : index
    %8 = vector.load %arg6[%c0_6, %c0_7] : memref<2x64xf32, #tpu.memory_space<vmem>>, vector<2x64xf32>
    tpu.vector_store %arg6[%c0_6, %c0_7], %7 {strides = array<i32>} : memref<2x64xf32, #tpu.memory_space<vmem>>, vector<2x64xf32>,
    %c0_i32_8 = arith.constant 0 : i32
    %9 = arith.cmpi eq, %arg1, %c0_i32_8 : i32
    %10 = arith.extui %9 : i1 to i32
    %c0_i32_9 = arith.constant 0 : i32
    %11 = arith.cmpi ne, %10, %c0_i32_9 : i32
    scf.if %11 {
      %c0_10 = arith.constant 0 : index
      %c0_11 = arith.constant 0 : index
      %12 = vector.load %arg6[%c0_10, %c0_11] : memref<2x64xf32, #tpu.memory_space<vmem>>, vector<2x64xf32>
      %c0_12 = arith.constant 0 : index
      %c0_13 = arith.constant 0 : index
      %13 = vector.load %arg4[%c0_12, %c0_13] : memref<1x64xf32, #tpu.memory_space<vmem>>, vector<1x64xf32>
      %14 = vector.broadcast %13 : vector<1x64xf32> to vector<2x64xf32>
      %15 = arith.addf %12, %14 : vector<2x64xf32>
      %c0_14 = arith.constant 0 : index
      %c0_15 = arith.constant 0 : index
      %16 = vector.load %arg5[%c0_14, %c0_15] : memref<2x64xf32, #tpu.memory_space<vmem>>, vector<2x64xf32>
      tpu.vector_store %arg5[%c0_14, %c0_15], %15 {strides = array<i32>} : memref<2x64xf32, #tpu.memory_space<vmem>>, vector<2x64xf32>,
    } else {
    }
    return
  }
  func.func @transform_0(%arg0: i32, %arg1: i32) -> (i32, i32) {
    %c0_i32 = arith.constant 0 : i32
    %c0_i32_0 = arith.constant 0 : i32
    return %c0_i32, %arg1 : i32, i32
  }
  func.func @transform_1(%arg0: i32, %arg1: i32) -> (i32, i32) {
    %c0_i32 = arith.constant 0 : i32
    return %arg1, %arg0 : i32, i32
  }
  func.func @transform_2(%arg0: i32, %arg1: i32) -> (i32, i32) {
    %c0_i32 = arith.constant 0 : i32
    %c0_i32_0 = arith.constant 0 : i32
    return %c0_i32, %arg0 : i32, i32
  }
  func.func @transform_3(%arg0: i32, %arg1: i32) -> (i32, i32) {
    %c0_i32 = arith.constant 0 : i32
    %c0_i32_0 = arith.constant 0 : i32
    return %c0_i32, %arg0 : i32, i32
  }
}

</mosaic_0001>

<bundles_post_ra>
// kernel: self_attention_module.5
= control target key start
LH: loop header
LB: loop body
LE: loop exit
PB: predicated region body
PF: predicated region fallthrough
CT: control target
= control target key end

     0   :  { %v231_v1 = vmov 0.0   ;;  %vm232_vm0 = vmmov 0   ;;  %vm20_vm1 = vcmask 517120   ;;  %s299_s0 = inlined_call_operand.vmem [shape: bf16[2,128], index: 0, kind: input, shape index: {}]   ;;  %s300_s1 = inlined_call_operand.vmem [shape: bf16[128,64], index: 1, kind: input, shape index: {}]   ;;  %s301_s2 = inlined_call_operand.vmem [shape: f32[1,64], index: 2, kind: input, shape index: {}]   ;;  %s302_s3 = inlined_call_operand.hbm [shape: f32[2,64], index: 3, kind: output, shape index: {}]  }
   0x1   :  { %v199_v0 = vld [vmem:[%s300_s1] sm:$0xff]   ;;  %176 = vmatprep.subr.bf16.mxu0 %v231_v1  ;;  %v200_v2 = vld [vmem:[%s300_s1 + $0x8] sm:$0xff]   ;;  %192 = vmatprep.mubr.msk.bf16.mxu0 %vm232_vm0, %v231_v1  ;;  %21 = vst.msk [vmem:[#allocation2] sm:$0x3] %vm20_vm1, %v231_v1  ;;  %v201_v3 = vld [vmem:[%s300_s1 + $0x10] sm:$0xff]  }
   0x2   :  { %177 = vmatpush3.bf16.msra.mxu0 %v199_v0 }
   0x3   :  { %178 = vmatprep.subr.bf16.mxu0 %v231_v1 }
   0x6   :  { %179 = vmatpush3.bf16.msra.mxu0 %v200_v2 }
   0x7   :  { %180 = vmatprep.subr.bf16.mxu0 %v231_v1 }
   0x8   :  { %8 = vsyncpa [#allocation4], 0  ;;  %v202_v4 = vld [vmem:[%s300_s1 + $0x18] sm:$0xff]   ;;  %v203_v5 = vld [vmem:[%s300_s1 + $0x20] sm:$0xff]  }
   0x9   :  { %v204_v6 = vld [vmem:[%s300_s1 + $0x28] sm:$0xff]   ;;  %v205_v7 = vld [vmem:[%s300_s1 + $0x30] sm:$0xff]   ;;  %v206_v8 = vld [vmem:[%s300_s1 + $0x38] sm:$0xff]   ;;  %s233_s1 = smov [#allocation3]  }
   0xa   :  { %181 = vmatpush3.bf16.msra.mxu0 %v201_v3  ;;  %v23_v9 = vld [vmem:[%s299_s0] sm:$0x1]  ;;  %s150_s5 = sshll.u32 %s233_s1, 4  ;;  %s151_s5 = int_to_ptr.vmem [resolvable:$true] %s150_s5 }
   0xb   :  { %182 = vmatprep.subr.bf16.mxu0 %v231_v1  ;;  %v22_v10 = vld [vmem:[#allocation2] sm:$0x3]  ;;  %s207_s0 = scalar_lea.vmem %s151_s5, 32  ;;  %p212_p1 = scmp.lt.s32.totalorder %s151_s5, %s151_s5 }
   0xc   :  { %v166_v16 = vld [vmem:[%s301_s2] ss:$0 sm:$0xff]  ;;  %p208_p0 = scmp.ne.s32.totalorder %s151_s5, %s207_s0  ;;  %p213_p2 = scmp.lt.s32.totalorder %s207_s0, %s207_s0 }
   0xe   :  { %183 = vmatpush3.bf16.msra.mxu0 %v202_v4  ;;  %p214_p3 = por %p213_p2, %p212_p1 }
   0xf   :  { %184 = vmatprep.subr.bf16.mxu0 %v231_v1 }
  0x10   :  { %p215_p4 = pnand %p214_p3, %p208_p0 }
  0x12   :  { %185 = vmatpush3.bf16.msra.mxu0 %v203_v5 }
  0x13   :  { %186 = vmatprep.subr.bf16.mxu0 %v231_v1 }
  0x16   :  { %187 = vmatpush3.bf16.msra.mxu0 %v204_v6 }
  0x17   :  { %188 = vmatprep.subr.bf16.mxu0 %v231_v1 }
  0x1a   :  { %189 = vmatpush3.bf16.msra.mxu0 %v205_v7 }
  0x1b   :  { %190 = vmatprep.subr.bf16.mxu0 %v231_v1 }
  0x1e   :  { %191 = vmatpush3.bf16.msra.mxu0 %v206_v8 }
  0x21   :  { %193 = vmatmul.mubr.bf16.vlgmr.msra.gmra.mrb[0].mxu0 %v23_v9 }
  0xf4   :  { %v122_v11 = vpop.f32.mrb[0].mxu0 }
  0xf5   :  { %v128_v12 = vadd.f32 %v122_v11, %v22_v10  ;;  %v194_v13 = vpop.f32.mrb[1].mxu0 }
  0xf6   :  { %v125_v14 = vpop.f32.mrb[2].mxu0 }
  0xf7   :  { %130 = vst.msk [vmem:[#allocation2] sm:$0x3] %vm20_vm1, %v128_v12  ;;  %v195_v15 = vpop.f32.mrb[3].mxu0 }
  0xfe   :  { %v134_v17 = vld [vmem:[#allocation2] sm:$0x3] }
  0xff   :  { %v142_v18 = vadd.f32 %v166_v16, %v134_v17 }
 0x101   :  { %143 = vst.msk [vmem:[#allocation3] sm:$0x3] %vm20_vm1, %v142_v18 }
 0x102   :  { %218 = shalt.err (!%p215_p4)
}
 0x103   :  { %s219_s8 = scalar_lea.hbm %s302_s3, 32 }
 0x104   :  { %p220_p5 = scmp.ne.s32.totalorder %s302_s3, %s219_s8  ;;  %p223_p6 = scmp.lt.u32.totalorder %s219_s8, %s302_s3 }
 0x106   :  { %p225_p7 = pnand %p223_p6, %p220_p5 }
 0x108   :  { %228 = shalt.err (!%p225_p7)
}
 0x109   :  { %153 = dma.vmem_to_hbm [thread:$0]  %s151_s5, 32, %s302_s3, [#allocation4]  }
 0x10a   :  { %229 = dma.done.wait [#allocation4], 32  }
 0x10b   :  { %230 = vsyncadd [#allocation4], 4294967264 }
 0x10c   :  { %157 = vsyncpa [#allocation4], 1 }

// kernel: self_attention_module.4
= control target key start
LH: loop header
LB: loop body
LE: loop exit
PB: predicated region body
PF: predicated region fallthrough
CT: control target
= control target key end

     0   :  { %8 = vsyncpa [#allocation4], 0  ;;  %s338_s12 = smov [#allocation3]   ;;  %s384_s0 = inlined_call_operand.vmem [shape: bf16[2,256], index: 0, kind: input, shape index: {}]   ;;  %s385_s1 = inlined_call_operand.hbm [shape: bf16[256,128], index: 1, kind: input, shape index: {}]   ;;  %s386_s2 = inlined_call_operand.vmem [shape: f32[1,128], index: 2, kind: input, shape index: {}]   ;;  %s387_s3 = inlined_call_operand.vmem [shape: bf16[2,128], index: 3, kind: output, shape index: {}]  }
   0x1   :  { %s16_s13 = sshll.u32 %s338_s12, 4  ;;  %s314_s16 = scalar_lea.hbm %s385_s1, 2048  ;;  %s17_s13 = int_to_ptr.vmem [resolvable:$true] %s16_s13 }
   0x2   :  { %p315_p0 = scmp.ne.s32.totalorder %s385_s1, %s314_s16  ;;  %p318_p1 = scmp.lt.u32.totalorder %s314_s16, %s385_s1 }
   0x4   :  { %p320_p2 = pnand %p318_p1, %p315_p0 }
   0x6   :  { %323 = shalt.err (!%p320_p2)
}
   0x7   :  { %s324_s21 = scalar_lea.vmem %s17_s13, 2048  ;;  %p329_p4 = scmp.lt.s32.totalorder %s17_s13, %s17_s13 }
   0x8   :  { %p325_p3 = scmp.ne.s32.totalorder %s17_s13, %s324_s21  ;;  %p330_p5 = scmp.lt.s32.totalorder %s324_s21, %s324_s21 }
   0xa   :  { %p331_p6 = por %p330_p5, %p329_p4 }
   0xc   :  { %p332_p7 = pnand %p331_p6, %p325_p3 }
   0xe   :  { %335 = shalt.err (!%p332_p7)
}
   0xf   :  { %s339_s22 = smov 64   ;;  %s340_s23 = smov 4  }
  0x10   :  { %22 = dma.hbm_to_vmem [thread:$0]  %s385_s1, 2048, %s17_s13, [#allocation4], %s339_s22, %s339_s22, %s340_s23  }
  0x11   :  { %336 = dma.done.wait [#allocation4], 2048  }
  0x12   :  { %337 = vsyncadd [#allocation4], 4294965248  ;;  %v296_v0 = vld [vmem:[#allocation3 + $0x40] sm:$0xff]   ;;  %v298_v2 = vld [vmem:[#allocation3 + $0x48] sm:$0xff]   ;;  %v341_v6 = vmov 1966171168   ;;  %v80_v8 = vlaneseq }
  0x13   :  { %v297_v1 = vld [vmem:[#allocation3] sm:$0xff]   ;;  %269 = vmatprep.subr.bf16.mxu0 %v296_v0  ;;  %v299_v3 = vld [vmem:[#allocation3 + $0x8] sm:$0xff]   ;;  %v300_v4 = vld [vmem:[#allocation3 + $0x50] sm:$0xff]   ;;  %v78_v7 = vunpack.c.l.s4 %v341_v6  ;;  %v342_v26 = vmov 0.0  }
  0x14   :  { %270 = vmatpush3.bf16.msra.mxu0 %v297_v1  ;;  %v301_v5 = vld [vmem:[#allocation3 + $0x10] sm:$0xff]   ;;  %v302_v9 = vld [vmem:[#allocation3 + $0x58] sm:$0xff]   ;;  %v81_v12 = vshrl.u32 %v80_v8, 7  ;;  %v304_v13 = vld [vmem:[#allocation3 + $0x60] sm:$0xff]   ;;  %33 = vst [vmem:[#allocation2] sm:$0x3] %v342_v26 }
  0x15   :  { %271 = vmatprep.subr.bf16.mxu0 %v298_v2  ;;  %v303_v10 = vld [vmem:[#allocation3 + $0x18] sm:$0xff]   ;;  %v79_v11 = vunpack.c.0.s8 %v78_v7  ;;  %v305_v14 = vld [vmem:[#allocation3 + $0x20] sm:$0xff]   ;;  %v306_v16 = vld [vmem:[#allocation3 + $0x68] sm:$0xff]  }
  0x16   :  { %v251_v17 = vld.sshfl [vmem:[%s384_s0] sm:$0x11 pattern:$0x75316420]  ;;  %v307_v19 = vld [vmem:[#allocation3 + $0x28] sm:$0xff]   ;;  %v308_v21 = vld [vmem:[#allocation3 + $0x70] sm:$0xff]  }
  0x17   :  { %v82_v15 = vsub.s32 %v79_v11, %v81_v12  ;;  %v76_v18 = vcombine.high %v251_v17, %v251_v17  ;;  %v309_v22 = vld [vmem:[#allocation3 + $0x30] sm:$0xff]   ;;  %v310_v23 = vld [vmem:[#allocation3 + $0x78] sm:$0xff]  }
  0x18   :  { %272 = vmatpush3.bf16.msra.mxu0 %v299_v3  ;;  %v311_v24 = vld [vmem:[#allocation3 + $0x38] sm:$0xff]  }
  0x19   :  { %273 = vmatprep.subr.bf16.mxu0 %v300_v4  ;;  %v90_v20 = vrot.slane %v76_v18, %v82_v15  ;;  %v83_v25 = vrot.slane %v251_v17, %v82_v15  ;;  %v268_v34 = vld [vmem:[%s386_s2] ss:$0 sm:$0xff] }
  0x1b   :  { %221 = vmatprep.mubr.bf16.mxu0 %v90_v20  ;;  %v34_v28 = vld [vmem:[#allocation2] sm:$0x3] }
  0x1c   :  { %274 = vmatpush3.bf16.msra.mxu0 %v301_v5 }
  0x1d   :  { %275 = vmatprep.subr.bf16.mxu0 %v302_v9 }
  0x20   :  { %276 = vmatpush3.bf16.msra.mxu0 %v303_v10 }
  0x21   :  { %277 = vmatprep.subr.bf16.mxu0 %v304_v13 }
  0x24   :  { %278 = vmatpush3.bf16.msra.mxu0 %v305_v14 }
  0x25   :  { %279 = vmatprep.subr.bf16.mxu0 %v306_v16 }
  0x28   :  { %280 = vmatpush3.bf16.msra.mxu0 %v307_v19 }
  0x29   :  { %281 = vmatprep.subr.bf16.mxu0 %v308_v21 }
  0x2c   :  { %282 = vmatpush3.bf16.msra.mxu0 %v309_v22 }
  0x2d   :  { %283 = vmatprep.subr.bf16.mxu0 %v310_v23 }
  0x30   :  { %284 = vmatpush3.bf16.msra.mxu0 %v311_v24 }
  0x33   :  { %222 = vmatmul.mubr.bf16.vlgmr.msra.gmra.mrb[0].mxu0 %v83_v25 }
 0x106   :  { %v285_v27 = vpop.f32.mrb[0].mxu0 }
 0x107   :  { %v286_v29 = vpop.f32.mrb[1].mxu0 }
 0x108   :  { %v287_v30 = vadd.f32 %v286_v29, %v285_v27  ;;  %v288_v31 = vpop.f32.mrb[2].mxu0 }
 0x109   :  { %v289_v32 = vpop.f32.mrb[3].mxu0 }
 0x10a   :  { %v229_v33 = vadd.f32 %v287_v30, %v34_v28 }
 0x10c   :  { %230 = vst [vmem:[#allocation2] sm:$0x3] %v229_v33 }
 0x113   :  { %v234_v35 = vld [vmem:[#allocation2] sm:$0x3] }
 0x114   :  { %v242_v36 = vadd.f32 %v268_v34, %v234_v35 }
 0x116   :  { %312 = vtanh.f32 %v242_v36 }
 0x120   :  { %v313_v37 = vpop.eup %312 }
 0x121   :  { %v244_v38 = vpack.c.bf16 %v313_v37, %v313_v37 }
 0x123   :  { %245 = vst [vmem:[%s387_s3] sm:$0x1] %v244_v38 }
 0x124   :  { %250 = vsyncpa [#allocation4], 1 }

// kernel: self_attention_module.3
= control target key start
LH: loop header
LB: loop body
LE: loop exit
PB: predicated region body
PF: predicated region fallthrough
CT: control target
= control target key end

     0   :  { %10 = vsyncpa [#allocation3], 0  ;;  %s1654_s0 = inlined_call_operand.hbm [shape: f32[2,8,32], index: 0, kind: input, shape index: {}]   ;;  %s1655_s1 = inlined_call_operand.vmem [shape: bf16[32,96], index: 1, kind: input, shape index: {}]   ;;  %s1656_s2 = inlined_call_operand.vmem [shape: f32[1,96], index: 2, kind: input, shape index: {}]   ;;  %s1657_s3 = inlined_call_operand.hbm [shape: bf16[4,8,32], index: 3, kind: input, shape index: {}]   ;;  %s1658_s4 = inlined_call_operand.vmem [shape: f32[1,32], index: 4, kind: input, shape index: {}]   ;;  %s1659_s5 = inlined_call_operand.vmem [shape: bf16[2,8,32], index: 5, kind: output, shape index: {}]  }
   0x1   :  { %12 = vsyncpa [#allocation3 + $0x1], 0 }
   0x2   :  { %13 = vsyncpa [#allocation5], 0  ;;  %s1404_s18 = smov 0   ;;  %s1406_s19 = smov 0  }
   0x3   :  { %s1408_s20 = smov 0   ;;  %s1410_s21 = smov 0  }
   0x4 LB: > { %s1423_s22 = sadd.s32 4294967295, %s1361_s21   ;;  %p39_p0 = scmp.ne.s32.totalorder %s1353_s19, %s1349_s18  ;;  %s1361_s21 = sphi %s1410_s21, %s1675_s21   ;;  %s1357_s20 = sphi %s1408_s20, %s1674_s20   ;;  %s1353_s19 = sphi %s1406_s19, %s1673_s19   ;;  %s1349_s18 = sphi %s1404_s18, %s1672_s18  }
   0x5   : > { %p1660_p1 = scmp.eq.s32.totalorder %s1423_s22, 0  ;;  %p1053_p2 = scmp.ge.s32.totalorder %s1361_s21, 1 }
   0x6   : > { %p160_p3 = scmp.lt.s32.totalorder %s1361_s21, 3  ;;  %s1363_s25 = smov [#allocation4]  }
   0x7   : > { %p1431_p4 = por %p1660_p1, %p39_p0  ;;  %s178_s26 = sshll.u32 %s1363_s25, 4  ;;  %s179_s26 = int_to_ptr.vmem [resolvable:$true] %s178_s26 }
   0x8   : > { %p1435_p5 = pnand %p1053_p2, %p160_p3  ;;  %s1448_s28 = sadd.s32 1, %s1361_s21  }
   0x9   : > { %s1663_s23 = scalar_select %p1431_p4, 1, 0 }
   0xa   : > { %s1664_s24 = scalar_select %p1435_p5, 1, 0 }
   0xb   : > { %p1194_p6 = pneg %p1435_p5  ;;  %s26_s29 = sadd.s32 1, %s1357_s20 }
   0xc   : > { %s23_s30 = ssub.s32 %s1361_s21, %s1448_s28  ;;  %s1265_s8 = scalar_lea.hbm %s1657_s3, 256 }
   0xd   : > { %p1443_p7 = pnand %p1194_p6, %p1660_p1  ;;  %p1266_p8 = scmp.ne.s32.totalorder %s1657_s3, %s1265_s8 }
   0xe   : > { %p1272_p12 = scmp.lt.u32.totalorder %s1265_s8, %s1657_s3 }
   0xf   : > { %p1267_p9 = pneg %p1443_p7 }
  0x11   : > { %p1268_p10 = pnand %p1267_p9, %p1266_p8 }
  0x13   : > { %p1269_p11 = pneg %p1268_p10 }
  0x15   : > { %p1274_p13 = pnand %p1272_p12, %p1269_p11 }
  0x17   : > { %1277 = shalt.err (!%p1274_p13)
}
  0x18   : > { %s1278_s13 = scalar_lea.vmem %s179_s26, 256  ;;  %p1286_p6 = scmp.lt.s32.totalorder %s179_s26, %s179_s26 }
  0x19   : > { %p1279_p0 = scmp.ne.s32.totalorder %s179_s26, %s1278_s13  ;;  %p1287_p1 = scmp.lt.s32.totalorder %s1278_s13, %s1278_s13 }
  0x1b   : > { %p1281_p2 = pnand %p1279_p0, %p1267_p9  ;;  %p1288_p4 = por %p1287_p1, %p1286_p6 }
  0x1d   : > { %p1282_p3 = pneg %p1281_p2 }
  0x1f   : > { %p1289_p5 = pnand %p1288_p4, %p1282_p3 }
  0x21   : > { %1292 = shalt.err (!%p1289_p5)
}
  0x22   : > { %s1364_s14 = smov 64   ;;  %s1365_s15 = smov 4  }
  0x23   : > { %1197 = dma.hbm_to_vmem [thread:$0]  (!%p1443_p7), %s1657_s3, 256, %s179_s26, [#allocation5], %s1364_s14, %s1364_s14, %s1365_s15  }
  0x24   : > { %p24_p8 = scmp.eq.s32.totalorder %s23_s30, 0  ;;  %p33_p9 = scmp.ne.s32.totalorder %s1357_s20, %s1353_s19 }
  0x25   : > { %p34_p1 = scmp.eq.s32.totalorder %s1361_s21, 0  ;;  %p1203_p4 = scmp.lt.s32.totalorder %s1361_s21, 2 }
  0x26   : > { %s1474_s18 = scalar_select %p24_p8, %s1357_s20, %s26_s29  }
  0x27   : > { %p35_p5 = por %p34_p1, %p33_p9  ;;  %s195_s25 = sand.u32 1, %s1357_s20  }
  0x28   : > { %s1056_s6 = sshll.u32 %s195_s25, 3  ;;  %s1057_s7 = sshll.u32 %s1361_s21, 7 }
  0x29   : > { %s1481_s10 = scalar_lea.hbm %s1654_s0, %s1057_s7  ;;  %s199_s26 = scalar_lea.vmem [#allocation2], %s1056_s6 }
  0x2a   : > { %s206_s27 = sshll.u32 %s199_s26, 4  ;;  %p1485_p7 = pnand %p1203_p4, %p35_p5  ;;  %s1483_s27 = int_to_ptr.vmem [resolvable:$true] %s206_s27 }
  0x2b   : > { %s196_s21 = scalar_lea.sflag [#allocation3], %s195_s25  ;;  %s1293_s30 = scalar_lea.hbm %s1481_s10, 128 }
  0x2c   : > { %p1294_p10 = scmp.ne.s32.totalorder %s1481_s10, %s1293_s30  ;;  %p1295_p11 = pneg %p1485_p7 }
  0x2d   : > { %s1298_s13 = scalar_lea.hbm %s1654_s0, 256  ;;  %p1299_p0 = scmp.lt.u32.totalorder %s1481_s10, %s1654_s0 }
  0x2e   : > { %p1296_p12 = pnand %p1295_p11, %p1294_p10  ;;  %p1300_p2 = scmp.lt.u32.totalorder %s1298_s13, %s1293_s30 }
  0x2f   : > { %p1302_p6 = scmp.lt.u32.totalorder %s1293_s30, %s1481_s10 }
  0x30   : > { %p1297_p13 = pneg %p1296_p12  ;;  %p1301_p3 = por %p1300_p2, %p1299_p0 }
  0x32   : > { %p1303_p8 = por %p1302_p6, %p1301_p3 }
  0x34   : > { %p1304_p9 = pnand %p1303_p8, %p1297_p13 }
  0x36   : > { %1307 = shalt.err (!%p1304_p9)
}
  0x37   : > { %s1308_s16 = scalar_lea.vmem %s1483_s27, 128  ;;  %s1366_s17 = smov [#allocation2]  }
  0x38   : > { %p1309_p1 = scmp.ne.s32.totalorder %s1483_s27, %s1308_s16  ;;  %s1313_s25 = sshll.u32 %s1366_s17, 4  ;;  %s1314_s25 = int_to_ptr.vmem [resolvable:$false] %s1313_s25 }
  0x39   : > { %s1315_s6 = scalar_lea.vmem %s1314_s25, 256  ;;  %p1316_p10 = scmp.lt.s32.totalorder %s1483_s27, %s1314_s25 }
  0x3a   : > { %p1311_p4 = pnand %p1309_p1, %p1295_p11  ;;  %p1317_p12 = scmp.lt.s32.totalorder %s1315_s6, %s1308_s16 }
  0x3c   : > { %p1312_p5 = pneg %p1311_p4  ;;  %p1318_p0 = por %p1317_p12, %p1316_p10 }
  0x3e   : > { %p1319_p2 = pnand %p1318_p0, %p1312_p5 }
  0x40   : > { %1322 = shalt.err (!%p1319_p2)
}
  0x41   : > { %1201 = dma.hbm_to_vmem [thread:$0]  (!%p1485_p7), %s1481_s10, 128, %s1483_s27, %s196_s21  }
  0x42   : > { %p1667_p13 = scmp.ne.s32.totalorder %s1664_s24, 0 }
  0x43   : > { %s217_s7 = sand.u32 (!%p1667_p13), 1, %s1353_s19   ;;  %p1668_p11 = scmp.ne.s32.totalorder (!%p1667_p13), %s1663_s23, 0 }
  0x44   : > { %215 = sbr.rel (%p1667_p13) target bundleno = 1513 (0x5e9), region = 40  ;;  %s1059_s8 = sshll.u32 (!%p1667_p13), %s217_s7, 3 }
  0x45   : > { %s218_s9 = scalar_lea.sflag (!%p1667_p13), [#allocation3], %s217_s7  ;;  %s221_s26 = scalar_lea.vmem (!%p1667_p13), [#allocation2], %s1059_s8 }
  0x4b   : > { %1340 = dma.done.wait (%p1668_p11), %s218_s9, 128  }
  0x4c   : > { %1342 = vsyncadd (%p1668_p11), %s218_s9, 4294967168  ;;  %p1669_p3 = scmp.eq.s32.totalorder %s1423_s22, 0 }
  0x4e   : > { %1344 = dma.done.wait (%p1669_p3), [#allocation5], 256   ;;  %p1670_p6 = pmov %p1669_p3 }
  0x4f   : > { %v1367_v0 = vmov 0.0   ;;  %vm1368_vm0 = vmmov 0   ;;  %v1247_v1 = vld [vmem:[%s1655_s1] sm:$0xff]   ;;  %v1248_v2 = vld [vmem:[%s1655_s1 + $0x8] sm:$0xff]   ;;  %vm281_vm1 = vcmask 261120   ;;  %s1369_s30 = smov 104  }
  0x50   : > { %1346 = vsyncadd (%p1670_p6), [#allocation5], 4294967040  ;;  %1108 = vmatprep.subr.bf16.mxu0 %v1367_v0  ;;  %1112 = vmatprep.mubr.msk.bf16.mxu0 %vm1368_vm0, %v1367_v0  ;;  %v256_v3 = vld [vmem:[%s221_s26] sm:$0xff]  ;;  %s1370_s11 = smov 120   ;;  %s1371_s12 = smov 96   ;;  %vm335_vm2 = vcmask 64512  }
  0x51   : > { %1116 = vmatprep.subr.bf16.mxu1 %v1367_v0  ;;  %1118 = vmatprep.mubr.msk.bf16.mxu1 %vm1368_vm0, %v1367_v0  ;;  %v257_v4 = vpack.c.bf16 %v256_v3, %v256_v3  ;;  %v1062_v5 = vld [vmem:[%s1656_s2] ss:$0 sm:$0xff]  ;;  %s1372_s13 = smov 112   ;;  %s1373_s14 = smov 64   ;;  %vm579_vm3 = vcmask 1043456   ;;  %vm975_vm4 = vcmask 257024  }
  0x52   : > { %1109 = vmatpush3.bf16.msra.mxu0 %v1247_v1  ;;  %p251_p7 = scmp.lt.s32.totalorder %s1423_s22, 1 }
  0x53   : > { %1110 = vmatprep.subr.bf16.mxu0 %v1367_v0 }
  0x54   : > { %s1677_s22 = smov (!%p251_p7, %s1423_s22), 1 }
  0x55   : > { %s1061_s17 = sshll.u32 %s1677_s22, 2 }
  0x56   : > { %1111 = vmatpush3.bf16.msra.mxu0 %v1248_v2  ;;  %s254_s7 = scalar_lea.vmem %s1659_s5, %s1061_s17 }
  0x57   : > { %1122 = vmatprep.subr.bf16.mxu0 %v1367_v0 }
  0x59   : > { %1113 = vmatmul.mubr.msk.bf16.vlgmr.msra.gmra.mrb[0].mxu0 %vm281_vm1, %v257_v4 }
  0x5a   : > { %1124 = vmatprep.mubr.msk.bf16.mxu0 %vm1368_vm0, %v1367_v0 }
 0x12c   : > { %v319_v6 = vpop.f32.mrb[0].mxu0 }
 0x12d   : > { %v320_v7 = vadd.f32 %v1062_v5, %v319_v6  ;;  %v1114_v8 = vpop.f32.mrb[1].mxu0 }
 0x12e   : > { %v322_v9 = vpop.f32.mrb[2].mxu0 }
 0x12f   : > { %v1545_v10 = vpack.c.bf16 %v320_v7, %v320_v7  ;;  %v1115_v11 = vpop.f32.mrb[3].mxu0 }
 0x131   : > { %331 = vrot.lane.b32.xlu1 %v1545_v10, %s1369_s30  ;;  %327 = vrot.lane.b32.xlu0 %v1545_v10, %s1370_s11 }
 0x135   : > { %333 = vrot.lane.b32.xlu1 %v1545_v10, %s1371_s12  ;;  %329 = vrot.lane.b32.xlu0 %v1545_v10, %s1372_s13 }
 0x1a3   : > { %v1551_v12 = vpop.permute.xlu1 %331  ;;  %v328_v13 = vpop.permute.xlu0 %327 }
 0x1a4   : > { %382 = vrot.lane.b32.xlu0 %v328_v13, %s1371_s12 }
 0x1a7   : > { %v334_v14 = vpop.permute.xlu1 %333  ;;  %v1553_v15 = vpop.permute.xlu0 %329 }
 0x1a8   : > { %478 = vrot.lane.b32.xlu0 %v1551_v12, %s1371_s12  ;;  %430 = vrot.lane.b32.xlu1 %v1553_v15, %s1371_s12  ;;  %v340_v16 = vsel %vm335_vm2, %v334_v14, 0 }
 0x1a9   : > { %1117 = vmatpush3.bf16.xpose.msra.mxu1 %v340_v16 }
 0x1aa   : > { %1128 = vmatprep.subr.bf16.mxu1 %v1367_v0 }
 0x1b0   : > { %1119 = vmatmul.mubr.msk.bf16.vlgmr.msra.gmra.mrb[0].mxu1 %vm335_vm2, %v1545_v10 }
 0x1b1   : > { %1130 = vmatprep.mubr.msk.bf16.mxu1 %vm1368_vm0, %v1367_v0 }
 0x216   : > { %v383_v17 = vpop.permute.xlu0 %382 }
 0x217   : > { %v388_v18 = vsel %vm335_vm2, %v383_v17, 0 }
 0x218   : > { %1123 = vmatpush3.bf16.xpose.msra.mxu0 %v388_v18  ;;  %v771_v18 = vld [vmem:[#allocation4] sm:$0xf] }
 0x219   : > { %1134 = vmatprep.subr.bf16.mxu0 %v1367_v0 }
 0x21a   : > { %v431_v19 = vpop.permute.xlu1 %430  ;;  %v479_v21 = vpop.permute.xlu0 %478 }
 0x21b   : > { %v436_v20 = vsel %vm335_vm2, %v431_v19, 0  ;;  %v484_v22 = vsel %vm335_vm2, %v479_v21, 0 }
 0x21c   : > { %1129 = vmatpush3.bf16.xpose.msra.mxu1 %v436_v20 }
 0x21d   : > { %1140 = vmatprep.subr.bf16.mxu1 %v1367_v0 }
 0x21f   : > { %1125 = vmatmul.mubr.msk.bf16.vlgmr.msra.gmra.mrb[4].mxu0 %vm335_vm2, %v328_v13 }
 0x220   : > { %1135 = vmatpush3.bf16.xpose.msra.mxu0 %v484_v22  ;;  %1136 = vmatprep.mubr.msk.bf16.mxu0 %vm1368_vm0, %v1367_v0  ;;  %v779_v22 = vsel %vm579_vm3, %v771_v18, 0 }
 0x221   : > { %1146 = vmatprep.subr.bf16.mxu0 %v1367_v0 }
 0x223   : > { %1131 = vmatmul.mubr.msk.bf16.vlgmr.msra.gmra.mrb[4].mxu1 %vm335_vm2, %v1553_v15 }
 0x224   : > { %1142 = vmatprep.mubr.msk.bf16.mxu1 %vm1368_vm0, %v1367_v0 }
 0x227   : > { %1137 = vmatmul.mubr.msk.bf16.vlgmr.msra.gmra.mrb[8].mxu0 %vm335_vm2, %v1551_v12 }
 0x228   : > { %1148 = vmatprep.mubr.msk.bf16.mxu0 %vm1368_vm0, %v1367_v0 }
 0x283   : > { %v376_v23 = vpop.f32.mrb[0].mxu1 }
 0x284   : > { %v1120_v24 = vpop.f32.mrb[1].mxu1  ;;  %v526_v25 = vsel %vm335_vm2, %v376_v23, -inf }
 0x285   : > { %v379_v26 = vpop.f32.mrb[2].mxu1  ;;  %527 = vmax.xlane.f32.xlu1 %v526_v25  ;;  %v772_v24 = vld [vmem:[#allocation4 + $0x4] sm:$0xf] }
 0x286   : > { %v1121_v27 = vpop.f32.mrb[3].mxu1 }
 0x287   : > { %v825_v27 = vsel %vm579_vm3, %v772_v24, 0 }
 0x2f2   : > { %v424_v28 = vpop.f32.mrb[4].mxu0 }
 0x2f3   : > { %v1126_v29 = vpop.f32.mrb[5].mxu0  ;;  %v529_v30 = vsel %vm335_vm2, %v424_v28, -inf }
 0x2f4   : > { %530 = vmax.xlane.f32.xlu0 %v529_v30  ;;  %v427_v31 = vpop.f32.mrb[6].mxu0 }
 0x2f5   : > { %v1127_v32 = vpop.f32.mrb[7].mxu0 }
 0x2f6   : > { %v472_v33 = vpop.f32.mrb[4].mxu1 }
 0x2f7   : > { %v1132_v34 = vpop.f32.mrb[5].mxu1  ;;  %v532_v35 = vsel %vm335_vm2, %v472_v33, -inf }
 0x2f8   : > { %v475_v36 = vpop.f32.mrb[6].mxu1  ;;  %533 = vmax.xlane.f32.xlu0 %v532_v35  ;;  %v774_v35 = vld [vmem:[#allocation4 + $0xc] sm:$0xf] }
 0x2f9   : > { %v1133_v37 = vpop.f32.mrb[7].mxu1 }
 0x2fa   : > { %v520_v38 = vpop.f32.mrb[8].mxu0 }
 0x2fb   : > { %v1138_v39 = vpop.f32.mrb[9].mxu0  ;;  %v535_v40 = vsel %vm335_vm2, %v520_v38, -inf }
 0x2fc   : > { %536 = vmax.xlane.f32.xlu1 %v535_v40  ;;  %v523_v41 = vpop.f32.mrb[10].mxu0  ;;  %v917_v39 = vsel %vm579_vm3, %v774_v35, 0 }
 0x2fd   : > { %v1139_v42 = vpop.f32.mrb[11].mxu0 }
 0x30d   : > { %623 = vrot.lane.b32.xlu1 %v328_v13, %s1373_s14 }
 0x30e   : > { %574 = vrot.lane.b32.xlu0 %v1545_v10, %s1373_s14 }
 0x312   : > { %v528_v43 = vpop.xlane.xlu1 %527 }
 0x313   : > { %v538_v44 = vsub.f32 %v376_v23, %v528_v43 }
 0x315   : > { %v542_v45 = vmul.f32 1.442695, %v538_v44 }
 0x317   : > { %1249 = vpow2.f32 %v542_v45 }
 0x321   : > { %v1250_v46 = vpop.eup %1249 }
 0x322   : > { %v550_v47 = vsel %vm335_vm2, %v1250_v46, 0.0 }
 0x32d   : > { %551 = vadd.xlane.f32.xlu0 %v550_v47 }
 0x381   : > { %v531_v48 = vpop.xlane.xlu0 %530 }
 0x382   : > { %v539_v49 = vsub.f32 %v424_v28, %v531_v48  ;;  %v773_v28 = vld [vmem:[#allocation4 + $0x8] sm:$0xf] }
 0x383   : > { %v871_v32 = vsel %vm579_vm3, %v773_v28, 0 }
 0x384   : > { %v544_v50 = vmul.f32 1.442695, %v539_v49 }
 0x385   : > { %v534_v51 = vpop.xlane.xlu0 %533 }
 0x386   : > { %1251 = vpow2.f32 %v544_v50  ;;  %v540_v52 = vsub.f32 %v472_v33, %v534_v51 }
 0x388   : > { %v546_v53 = vmul.f32 1.442695, %v540_v52 }
 0x389   : > { %v575_v54 = vpop.permute.xlu0 %574  ;;  %v537_v55 = vpop.xlane.xlu1 %536 }
 0x38a   : > { %1253 = vpow2.f32 %v546_v53  ;;  %v581_v56 = vsel %vm579_vm3, %v575_v54, 0  ;;  %v541_v57 = vsub.f32 %v520_v38, %v537_v55 }
 0x38b   : > { %1141 = vmatpush3.bf16.msra.mxu1 %v581_v56 }
 0x38c   : > { %v548_v58 = vmul.f32 1.442695, %v541_v57  ;;  %1152 = vmatprep.subr.bf16.mxu1 %v1367_v0 }
 0x38d   : > { %v624_v59 = vpop.permute.xlu1 %623 }
 0x38e   : > { %1255 = vpow2.f32 %v548_v58  ;;  %v629_v60 = vsel %vm579_vm3, %v624_v59, 0 }
 0x38f   : > { %1147 = vmatpush3.bf16.msra.mxu0 %v629_v60 }
 0x390   : > { %v1252_v61 = vpop.eup %1251  ;;  %1158 = vmatprep.subr.bf16.mxu0 %v1367_v0 }
 0x391   : > { %v553_v62 = vsel %vm335_vm2, %v1252_v61, 0.0 }
 0x392   : > { %554 = vadd.xlane.f32.xlu1 %v553_v62 }
 0x394   : > { %v1254_v63 = vpop.eup %1253 }
 0x395   : > { %v556_v1 = vsel %vm335_vm2, %v1254_v63, 0.0 }
 0x396   : > { %557 = vadd.xlane.f32.xlu0 %v556_v1 }
 0x398   : > { %v1256_v2 = vpop.eup %1255 }
 0x399   : > { %v559_v3 = vsel %vm335_vm2, %v1256_v2, 0.0 }
 0x39a   : > { %560 = vadd.xlane.f32.xlu1 %v559_v3 }
 0x3ab   : > { %671 = vrot.lane.b32.xlu1 %v1553_v15, %s1373_s14 }
 0x3ac   : > { %719 = vrot.lane.b32.xlu0 %v1551_v12, %s1373_s14 }
 0x3ba   : > { %v552_v4 = vpop.xlane.xlu0 %551 }
 0x3bb   : > { %1257 = vrcp.f32 %v552_v4 }
 0x3c5   : > { %v1258_v5 = vpop.eup %1257 }
 0x3c6   : > { %v566_v6 = vmul.f32 %v1258_v5, %v1250_v46 }
 0x3c8   : > { %v570_v7 = vpack.c.bf16 %v566_v6, %v566_v6 }
 0x3ca   : > { %1143 = vmatmul.mubr.msk.bf16.vlgmr.msra.gmra.mrb[8].mxu1 %vm335_vm2, %v570_v7  ;;  %v1078_v7 = vld [vmem:[%s1658_s4] ss:$0 sm:$0xff] }
 0x3cb   : > { %1154 = vmatprep.mubr.msk.bf16.mxu1 %vm1368_vm0, %v1367_v0 }
 0x41f   : > { %v555_v8 = vpop.xlane.xlu1 %554 }
 0x420   : > { %1259 = vrcp.f32 %v555_v8 }
 0x423   : > { %v558_v9 = vpop.xlane.xlu0 %557 }
 0x424   : > { %1261 = vrcp.f32 %v558_v9 }
 0x427   : > { %v561_v10 = vpop.xlane.xlu1 %560  ;;  %v720_v12 = vpop.permute.xlu0 %719 }
 0x428   : > { %1263 = vrcp.f32 %v561_v10  ;;  %v725_v20 = vsel %vm579_vm3, %v720_v12, 0 }
 0x42a   : > { %v1260_v11 = vpop.eup %1259 }
 0x42b   : > { %v567_v13 = vmul.f32 %v1260_v11, %v1252_v61  ;;  %v672_v14 = vpop.permute.xlu1 %671 }
 0x42c   : > { %v677_v15 = vsel %vm579_vm3, %v672_v14, 0 }
 0x42d   : > { %1153 = vmatpush3.bf16.msra.mxu1 %v677_v15  ;;  %v571_v16 = vpack.c.bf16 %v567_v13, %v567_v13 }
 0x42e   : > { %v1262_v17 = vpop.eup %1261  ;;  %1164 = vmatprep.subr.bf16.mxu1 %v1367_v0 }
 0x42f   : > { %v568_v19 = vmul.f32 %v1262_v17, %v1254_v63  ;;  %1149 = vmatmul.mubr.msk.bf16.vlgmr.msra.gmra.mrb[12].mxu0 %vm335_vm2, %v571_v16 }
 0x430   : > { %1159 = vmatpush3.bf16.msra.mxu0 %v725_v20  ;;  %1160 = vmatprep.mubr.msk.bf16.mxu0 %vm1368_vm0, %v1367_v0 }
 0x431   : > { %v572_v21 = vpack.c.bf16 %v568_v19, %v568_v19  ;;  %1170 = vmatprep.subr.bf16.mxu0 %v1367_v0 }
 0x432   : > { %v1264_v23 = vpop.eup %1263 }
 0x433   : > { %v569_v25 = vmul.f32 %v1264_v23, %v1256_v2  ;;  %1155 = vmatmul.mubr.msk.bf16.vlgmr.msra.gmra.mrb[12].mxu1 %vm335_vm2, %v572_v21 }
 0x434   : > { %1165 = vmatpush3.bf16.msra.mxu1 %v779_v22  ;;  %1166 = vmatprep.mubr.msk.bf16.mxu1 %vm1368_vm0, %v1367_v0 }
 0x435   : > { %v573_v26 = vpack.c.bf16 %v569_v25, %v569_v25  ;;  %1176 = vmatprep.subr.bf16.mxu1 %v1367_v0 }
 0x437   : > { %1161 = vmatmul.mubr.msk.bf16.vlgmr.msra.gmra.mrb[16].mxu0 %vm335_vm2, %v573_v26 }
 0x438   : > { %1171 = vmatpush3.bf16.msra.mxu0 %v825_v27  ;;  %1172 = vmatprep.mubr.msk.bf16.mxu0 %vm1368_vm0, %v1367_v0 }
 0x439   : > { %1182 = vmatprep.subr.bf16.mxu0 %v1367_v0 }
 0x49d   : > { %v617_v29 = vpop.f32.mrb[8].mxu1 }
 0x49e   : > { %v767_v30 = vpack.c.bf16 %v617_v29, %v617_v29  ;;  %v1144_v31 = vpop.f32.mrb[9].mxu1 }
 0x49f   : > { %v620_v33 = vpop.f32.mrb[10].mxu1 }
 0x4a0   : > { %v1145_v34 = vpop.f32.mrb[11].mxu1  ;;  %1167 = vmatmul.mubr.msk.bf16.vlgmr.msra.gmra.mrb[16].mxu1 %vm335_vm2, %v767_v30 }
 0x4a1   : > { %1177 = vmatpush3.bf16.msra.mxu1 %v871_v32  ;;  %1178 = vmatprep.mubr.msk.bf16.mxu1 %vm1368_vm0, %v1367_v0 }
 0x502   : > { %v665_v36 = vpop.f32.mrb[12].mxu0 }
 0x503   : > { %v768_v37 = vpack.c.bf16 %v665_v36, %v665_v36  ;;  %v1150_v38 = vpop.f32.mrb[13].mxu0 }
 0x504   : > { %v668_v40 = vpop.f32.mrb[14].mxu0 }
 0x505   : > { %v1151_v41 = vpop.f32.mrb[15].mxu0  ;;  %1173 = vmatmul.mubr.msk.bf16.vlgmr.msra.gmra.mrb[20].mxu0 %vm335_vm2, %v768_v37 }
 0x506   : > { %v713_v42 = vpop.f32.mrb[12].mxu1  ;;  %1183 = vmatpush3.bf16.msra.mxu0 %v917_v39  ;;  %1184 = vmatprep.mubr.msk.bf16.mxu0 %vm1368_vm0, %v1367_v0 }
 0x507   : > { %v769_v43 = vpack.c.bf16 %v713_v42, %v713_v42  ;;  %v1156_v44 = vpop.f32.mrb[13].mxu1 }
 0x508   : > { %v716_v45 = vpop.f32.mrb[14].mxu1 }
 0x509   : > { %v1157_v46 = vpop.f32.mrb[15].mxu1  ;;  %1179 = vmatmul.mubr.msk.bf16.vlgmr.msra.gmra.mrb[20].mxu1 %vm335_vm2, %v769_v43 }
 0x50a   : > { %v761_v47 = vpop.f32.mrb[16].mxu0 }
 0x50b   : > { %v770_v48 = vpack.c.bf16 %v761_v47, %v761_v47  ;;  %v1162_v49 = vpop.f32.mrb[17].mxu0 }
 0x50c   : > { %v764_v50 = vpop.f32.mrb[18].mxu0 }
 0x50d   : > { %v1163_v51 = vpop.f32.mrb[19].mxu0  ;;  %1185 = vmatmul.mubr.msk.bf16.vlgmr.msra.gmra.mrb[24].mxu0 %vm335_vm2, %v770_v48 }
 0x573   : > { %v815_v52 = vpop.f32.mrb[16].mxu1 }
 0x574   : > { %v1168_v53 = vpop.f32.mrb[17].mxu1  ;;  %v959_v56 = vsel %vm281_vm1, %v815_v52, 0.0 }
 0x575   : > { %v818_v54 = vpop.f32.mrb[18].mxu1 }
 0x576   : > { %v1169_v55 = vpop.f32.mrb[19].mxu1 }
 0x5d8   : > { %v861_v0 = vpop.f32.mrb[20].mxu0 }
 0x5d9   : > { %v960_v57 = vsel %vm281_vm1, %v861_v0, 0.0  ;;  %v1174_v58 = vpop.f32.mrb[21].mxu0 }
 0x5da   : > { %v961_v59 = vadd.f32 %v960_v57, %v959_v56  ;;  %v864_v60 = vpop.f32.mrb[22].mxu0 }
 0x5db   : > { %v1175_v61 = vpop.f32.mrb[23].mxu0 }
 0x5dc   : > { %v907_v62 = vpop.f32.mrb[20].mxu1 }
 0x5dd   : > { %v962_v63 = vsel %vm281_vm1, %v907_v62, 0.0  ;;  %v1180_v1 = vpop.f32.mrb[21].mxu1 }
 0x5de   : > { %v963_v2 = vadd.f32 %v962_v63, %v961_v59  ;;  %v910_v3 = vpop.f32.mrb[22].mxu1 }
 0x5df   : > { %v1181_v4 = vpop.f32.mrb[23].mxu1 }
 0x5e0   : > { %v953_v5 = vpop.f32.mrb[24].mxu0 }
 0x5e1   : > { %v964_v6 = vsel %vm281_vm1, %v953_v5, 0.0  ;;  %v1186_v8 = vpop.f32.mrb[25].mxu0 }
 0x5e2   : > { %v965_v9 = vadd.f32 %v964_v6, %v963_v2  ;;  %v956_v10 = vpop.f32.mrb[26].mxu0 }
 0x5e3   : > { %v1187_v11 = vpop.f32.mrb[27].mxu0 }
 0x5e4   : > { %v973_v13 = vadd.f32 %v1078_v7, %v965_v9 }
 0x5e6   : > { %v974_v14 = vpack.c.bf16 %v973_v13, %v973_v13 }
 0x5e8   : > { %976 = vst.msk [vmem:[%s254_s7] sm:$0xf] %vm975_vm4, %v974_v14 }
 0x5e9 PF: > { %s1671_s8 = smov %s1474_s18  ;;  %p16_p8 = scmp.ge.s32.totalorder %s1448_s28, 4  }
 0x5ea   : > { %s1672_s18 = smov %s1353_s19  ;;  %s1673_s19 = smov %s1357_s20 }
 0x5eb   : > { %s1674_s20 = smov %s1671_s8  ;;  %s1675_s21 = smov %s1448_s28 }
 0x5ec   :  { %18 = sbr.rel (!%p16_p8) target bundleno = 4 (0x4), region = 84 }
 0x5f3   :  { %996 = vsyncpa [#allocation3], 1 }
 0x5f4   :  { %998 = vsyncpa [#allocation3 + $0x1], 1 }
 0x5f5   :  { %999 = vsyncpa [#allocation5], 1 }

</bundles_post_ra>
